<compile_context>
chip_gen: v5e
topology: v5e:2x2
jax: 0.10.0
libtpu: 0.0.40
codegen_flags: <defaults>
</compile_context>

<pallas_src>
import functools

import jax
import jax.numpy as jnp
from jax import lax
from jax.experimental import pallas as pl
from jax.experimental.pallas import tpu as pltpu

LN_EPS = 1e-12            # BERT LayerNorm eps
_INV_SQRT2 = 0.7071067811865476


def _round_up(x, m):
    return ((x + m - 1) // m) * m


def _cdiv(a, b):
    return (a + b - 1) // b


def _chip_defaults():
    """(tm_target, tv_target, physical VMEM bytes) for the local TPU."""
    try:
        kind = jax.devices()[0].device_kind.lower()
    except Exception:
        kind = ""
    vmem_cap = None
    try:
        vmem_cap = int(pltpu.get_tpu_info().vmem_capacity_bytes)
    except Exception:
        vmem_cap = None
    if "v6" in kind:                    # v6e: ridge ~655 flop/B -> big row tile
        return 1024, 1024, vmem_cap or (128 << 20)
    if "7" in kind:                     # v7x: 64 MiB VMEM/TC, ridge ~310
        return 512, 1024, vmem_cap or (64 << 20)
    if "v5" in kind:                    # v5e: ridge ~240
        return 512, 1024, vmem_cap or (128 << 20)
    return 512, 1024, vmem_cap or (64 << 20)   # conservative default


def _mlm_head_kernel(x_ref, w_t_ref, b_t_ref, gamma_ref, beta_ref,
                     w_dec_ref, b_dec_ref, out_ref, h_scratch):
    """Fused BertLMPredictionHead for one (row-tile, vocab-tile) grid cell.

    Grid: (rows, vocab) with vocab innermost.  The transform is computed once
    per row tile (j == 0) into `h_scratch` (bf16), which persists across the
    vocab sweep; every step runs one NN-form decoder matmul tile on the MXU.
    """
    j = pl.program_id(1)

    @pl.when(j == 0)
    def _():
        # Dense transform: x(tm, H_in) @ W_t^T(H_in, H_out) -> f32 (tm, H).
        # Weights were pre-transposed in the wrapper so the RHS is MXU-native
        # (k, n); no per-tile XLU transpose.
        t = jnp.dot(x_ref[...], w_t_ref[...],
                    preferred_element_type=jnp.float32) + b_t_ref[...]
        # Exact (erf-based) GELU, as in the original BERT head.
        g = 0.5 * t * (1.0 + lax.erf(t * _INV_SQRT2))
        # LayerNorm over the hidden dim (f32 math).
        mu = jnp.mean(g, axis=-1, keepdims=True)
        var = jnp.mean((g - mu) * (g - mu), axis=-1, keepdims=True)
        hn = (g - mu) * lax.rsqrt(var + LN_EPS)
        h_scratch[...] = (hn * gamma_ref[...] + beta_ref[...]).astype(
            h_scratch.dtype)

    # Decoder tile: h(tm, H) @ W_dec^T_tile(H, tv) -> (tm, tv), f32 accum.
    out_ref[...] = (
        jnp.dot(h_scratch[...], w_dec_ref[...],
                preferred_element_type=jnp.float32)
        + b_dec_ref[...]).astype(out_ref.dtype)


@functools.partial(jax.jit,
                   static_argnames=("tm", "tv", "out_dtype", "vmem_limit"))
def _run(x, w_t, b_t, gamma, beta, w_dec, b_dec, *, tm, tv, out_dtype,
         vmem_limit):
    Mp, H = x.shape
    Vp = w_dec.shape[1]
    grid = (Mp // tm, Vp // tv)
    compute_dtype = x.dtype

    # TODO(synk): on v7x, pl.Buffered(1) on the grid-invariant operands
    # (w_t/b_t/gamma/beta) would free ~H*H*2B of VMEM; left at default
    # buffering here for lowering robustness.
    return pl.pallas_call(
        _mlm_head_kernel,
        out_shape=jax.ShapeDtypeStruct((Mp, Vp), out_dtype),
        grid_spec=pltpu.PrefetchScalarGridSpec(
            num_scalar_prefetch=0,
            grid=grid,
            in_specs=[
                pl.BlockSpec((tm, H), lambda i, j: (i, 0)),   # x row tile
                pl.BlockSpec((H, H), lambda i, j: (0, 0)),    # W_t^T (in,out)
                pl.BlockSpec((1, H), lambda i, j: (0, 0)),    # transform bias
                pl.BlockSpec((1, H), lambda i, j: (0, 0)),    # LN gamma
                pl.BlockSpec((1, H), lambda i, j: (0, 0)),    # LN beta
                pl.BlockSpec((H, tv), lambda i, j: (0, j)),   # W_dec^T tile
                pl.BlockSpec((1, tv), lambda i, j: (0, j)),   # decoder bias
            ],
            out_specs=pl.BlockSpec((tm, tv), lambda i, j: (i, j)),
            scratch_shapes=[pltpu.VMEM((tm, H), compute_dtype)],
        ),
        compiler_params=pltpu.CompilerParams(
            dimension_semantics=("parallel", "arbitrary"),
            vmem_limit_bytes=vmem_limit),
    )(x, w_t, b_t, gamma, beta, w_dec, b_dec)


def prepare_mlm_head_params(params, *, tv=None, compute_dtype=jnp.bfloat16):
    """One-time parameter prep (cast / transpose / pad).

    Call once at parameter-load time so the ~V*H decoder weight is NOT
    re-cast / re-padded / re-transposed in HBM on every forward call.
    """
    H = int(params["transform_weight"].shape[0])
    V = int(params["decoder_bias"].shape[0])
    if tv is None:
        tv = _chip_defaults()[1]
    tv = min(tv, _round_up(V, 128))
    Vp = _round_up(V, tv)

    w_t_T = jnp.asarray(params["transform_weight"]).astype(compute_dtype).T
    w_dec_T = jnp.asarray(params["decoder_weight"]).astype(compute_dtype).T
    b_dec = jnp.asarray(params["decoder_bias"]).astype(jnp.float32).reshape(1, V)
    if Vp != V:
        w_dec_T = jnp.pad(w_dec_T, ((0, 0), (0, Vp - V)))
        b_dec = jnp.pad(b_dec, ((0, 0), (0, Vp - V)))

    return {
        "_prepared": True,
        "H": H, "V": V, "tv": tv,
        "w_t_T": w_t_T,                                                 # (H, H)
        "b_t": jnp.asarray(params["transform_bias"]).astype(jnp.float32).reshape(1, H),
        "ln_gamma": jnp.asarray(params["ln_gamma"]).astype(jnp.float32).reshape(1, H),
        "ln_beta": jnp.asarray(params["ln_beta"]).astype(jnp.float32).reshape(1, H),
        "w_dec_T": w_dec_T,                                             # (H, Vp)
        "b_dec": b_dec,                                                 # (1, Vp)
        "compute_dtype": compute_dtype,
    }


def bert_mlm_pretraining_heads(sequence_output, pooled_output, params, *,
                               tm=None, tv=None, out_dtype=jnp.bfloat16,
                               compute_dtype=jnp.bfloat16):
    """JAX wrapper reproducing BertMLMPreTrainingHeads.forward.

    `params` may be the raw PyTorch-layout dict (prepared on the fly) or the
    output of prepare_mlm_head_params (preferred: prepare once at load time).
    For training-quality logits feeding a softmax, pass out_dtype=jnp.float32.
    """
    del pooled_output  # unused by the PyTorch forward
    if not params.get("_prepared", False):
        params = prepare_mlm_head_params(params, tv=tv,
                                         compute_dtype=compute_dtype)

    B, S, H = sequence_output.shape
    V = params["V"]
    tv = params["tv"]
    compute_dtype = params["compute_dtype"]
    M = B * S

    tm_target, _, vmem_cap = _chip_defaults()
    if tm is None:
        tm = tm_target
    # bf16 packs 16 sublanes per vreg -> keep tm a multiple of 16.
    tm = min(tm, _round_up(M, 16))
    # Dual-TC / megacore: make sure the "parallel" row axis has >=2 tiles.
    if M >= 32 and _cdiv(M, tm) < 2:
        tm = _round_up(_cdiv(M, 2), 16)

    cbytes = jnp.dtype(compute_dtype).itemsize
    obytes = jnp.dtype(out_dtype).itemsize

    def _need(tm_):
        return (2 * tm_ * H * cbytes          # x row tile (double buffered)
                + 2 * H * H * cbytes          # W_t^T
                + 2 * H * tv * cbytes         # W_dec^T tile
                + 2 * tm_ * tv * obytes       # out tile
                + tm_ * H * cbytes            # h scratch
                + 4 * tm_ * H * 4             # f32 transform/LN transients
                + 6 * H * 4 + 2 * tv * 4)     # biases / gamma / beta

    # Shrink tm if the footprint would exceed ~85% of physical VMEM (v7x has
    # only 64 MiB/TC); otherwise grant the kernel what it needs plus headroom.
    while _need(tm) > int(0.85 * vmem_cap) and tm > 128:
        tm = max(128, tm // 2)
    vmem_limit = int(max(32 << 20, min(_need(tm) + (32 << 20),
                                       int(0.9 * vmem_cap))))

    Mp = _round_up(M, tm)
    x = sequence_output.reshape(M, H).astype(compute_dtype)
    if Mp != M:
        x = jnp.pad(x, ((0, Mp - M), (0, 0)))

    out = _run(x, params["w_t_T"], params["b_t"], params["ln_gamma"],
               params["ln_beta"], params["w_dec_T"], params["b_dec"],
               tm=tm, tv=tv, out_dtype=out_dtype, vmem_limit=vmem_limit)

    # TODO(synk): if the consumer is MLM cross-entropy, fuse logsumexp/loss
    # into the vocab sweep instead of materializing (M, V) logits in HBM.
    return out[:M, :V].reshape(B, S, V)


def _reference(sequence_output, params):
    x = sequence_output.astype(jnp.float32)
    t = x @ params["transform_weight"].astype(jnp.float32).T + params["transform_bias"]
    g = 0.5 * t * (1.0 + lax.erf(t * _INV_SQRT2))
    mu = jnp.mean(g, axis=-1, keepdims=True)
    var = jnp.mean((g - mu) ** 2, axis=-1, keepdims=True)
    h = (g - mu) * lax.rsqrt(var + LN_EPS)
    h = h * params["ln_gamma"] + params["ln_beta"]
    return h @ params["decoder_weight"].astype(jnp.float32).T + params["decoder_bias"]


if __name__ == "__main__":
    key = jax.random.PRNGKey(0)

    # --- Test 1: small BERT-ish, tile-aligned shapes (prepared params path) ---
    B, S, H, V = 2, 8, 32, 256
    ks = jax.random.split(key, 7)
    sequence_output = jax.random.normal(ks[0], (B, S, H), dtype=jnp.float32)
    pooled_output = jax.random.normal(ks[1], (B, H), dtype=jnp.float32)  # unused
    params = {
        "transform_weight": 0.05 * jax.random.normal(ks[2], (H, H), jnp.float32),
        "transform_bias":   0.01 * jax.random.normal(ks[3], (H,), jnp.float32),
        "ln_gamma":         jnp.ones((H,), jnp.float32),
        "ln_beta":          jnp.zeros((H,), jnp.float32),
        "decoder_weight":   0.05 * jax.random.normal(ks[4], (V, H), jnp.float32),
        "decoder_bias":     0.01 * jax.random.normal(ks[5], (V,), jnp.float32),
    }
    prepared = prepare_mlm_head_params(params)          # hoisted, once
    scores = bert_mlm_pretraining_heads(sequence_output, pooled_output, prepared)
    scores = jax.block_until_ready(scores)
    ref = _reference(sequence_output, params)
    assert scores.shape == (B, S, V)
    assert jnp.allclose(scores.astype(jnp.float32), ref, atol=2e-2, rtol=2e-2), \
        "mismatch vs reference (test 1)"

    # --- Test 2: ragged M / V exercise the padding path (raw params path) ---
    B2, S2, H2, V2 = 1, 5, 32, 200
    ks2 = jax.random.split(jax.random.PRNGKey(1), 7)
    seq2 = jax.random.normal(ks2[0], (B2, S2, H2), dtype=jnp.float32)
    pool2 = jax.random.normal(ks2[1], (B2, H2), dtype=jnp.float32)  # unused
    params2 = {
        "transform_weight": 0.05 * jax.random.normal(ks2[2], (H2, H2), jnp.float32),
        "transform_bias":   0.01 * jax.random.normal(ks2[3], (H2,), jnp.float32),
        "ln_gamma":         jnp.ones((H2,), jnp.float32),
        "ln_beta":          jnp.zeros((H2,), jnp.float32),
        "decoder_weight":   0.05 * jax.random.normal(ks2[4], (V2, H2), jnp.float32),
        "decoder_bias":     0.01 * jax.random.normal(ks2[5], (V2,), jnp.float32),
    }
    scores2 = bert_mlm_pretraining_heads(seq2, pool2, params2)
    scores2 = jax.block_until_ready(scores2)
    ref2 = _reference(seq2, params2)
    assert scores2.shape == (B2, S2, V2)
    assert jnp.allclose(scores2.astype(jnp.float32), ref2, atol=2e-2, rtol=2e-2), \
        "mismatch vs reference (test 2, ragged shapes)"

    print("KERNEL_OK")
</pallas_src>

<mosaic_0001>
module attributes {stable_mosaic.version = 11 : i64} {
  func.func @_mlm_head_kernel(%arg0: i32, %arg1: i32, %arg2: memref<16x32xbf16, #tpu.memory_space<vmem>>, %arg3: memref<32x32xbf16, #tpu.memory_space<vmem>>, %arg4: memref<1x32xf32, #tpu.memory_space<vmem>>, %arg5: memref<1x32xf32, #tpu.memory_space<vmem>>, %arg6: memref<1x32xf32, #tpu.memory_space<vmem>>, %arg7: memref<32x256xbf16, #tpu.memory_space<vmem>>, %arg8: memref<1x256xf32, #tpu.memory_space<vmem>>, %arg9: memref<16x256xbf16, #tpu.memory_space<vmem>>, %arg10: memref<16x32xbf16, #tpu.memory_space<vmem>>) attributes {dimension_semantics = [#tpu.dimension_semantics<parallel>, #tpu.dimension_semantics<arbitrary>], iteration_bounds = array<i64: 1, 1>, scalar_prefetch = 0 : i64, scratch_operands = 1 : i64, tpu.core_type = #tpu.core_type<tc>, window_params = [{transform_indices = @transform_0, window_bounds = array<i64: 16, 32>}, {pipeline_mode = #tpu.pipeline_mode<synchronous>, transform_indices = @transform_1, window_bounds = array<i64: 32, 32>}, {pipeline_mode = #tpu.pipeline_mode<synchronous>, transform_indices = @transform_2, window_bounds = array<i64: 1, 32>}, {pipeline_mode = #tpu.pipeline_mode<synchronous>, transform_indices = @transform_3, window_bounds = array<i64: 1, 32>}, {pipeline_mode = #tpu.pipeline_mode<synchronous>, transform_indices = @transform_4, window_bounds = array<i64: 1, 32>}, {transform_indices = @transform_5, window_bounds = array<i64: 32, 256>}, {transform_indices = @transform_6, window_bounds = array<i64: 1, 256>}, {transform_indices = @transform_7, window_bounds = array<i64: 16, 256>}]} {
    %c0_i32 = arith.constant 0 : i32
    %0 = arith.cmpi eq, %arg1, %c0_i32 : i32
    %1 = arith.extui %0 : i1 to i32
    %c0_i32_0 = arith.constant 0 : i32
    %2 = arith.cmpi ne, %1, %c0_i32_0 : i32
    scf.if %2 {
      %c0_8 = arith.constant 0 : index
      %c0_9 = arith.constant 0 : index
      %11 = vector.load %arg2[%c0_8, %c0_9] : memref<16x32xbf16, #tpu.memory_space<vmem>>, vector<16x32xbf16>
      %c0_10 = arith.constant 0 : index
      %c0_11 = arith.constant 0 : index
      %12 = vector.load %arg3[%c0_10, %c0_11] : memref<32x32xbf16, #tpu.memory_space<vmem>>, vector<32x32xbf16>
      %cst_12 = arith.constant dense<0.000000e+00> : vector<16x32xf32>
      %13 = tpu.matmul %11, %12, %cst_12 {dimension_numbers = #tpu.dot_dimension_numbers<[1], [0], [0], [1], [0, 0, 1, 1], [], []>} : vector<16x32xbf16>, vector<32x32xbf16>, vector<16x32xf32> -> vector<16x32xf32>
      %c0_13 = arith.constant 0 : index
      %c0_14 = arith.constant 0 : index
      %14 = vector.load %arg4[%c0_13, %c0_14] : memref<1x32xf32, #tpu.memory_space<vmem>>, vector<1x32xf32>
      %15 = vector.broadcast %14 : vector<1x32xf32> to vector<16x32xf32>
      %16 = arith.addf %13, %15 : vector<16x32xf32>
      %cst_15 = arith.constant 5.000000e-01 : f32
      %17 = vector.broadcast %cst_15 : f32 to vector<16x32xf32>
      %18 = arith.mulf %17, %16 : vector<16x32xf32>
      %cst_16 = arith.constant 0.707106769 : f32
      %19 = vector.broadcast %cst_16 : f32 to vector<16x32xf32>
      %20 = arith.mulf %16, %19 : vector<16x32xf32>
      %21 = math.erf %20 : vector<16x32xf32>
      %cst_17 = arith.constant 1.000000e+00 : f32
      %22 = vector.broadcast %cst_17 : f32 to vector<16x32xf32>
      %23 = arith.addf %22, %21 : vector<16x32xf32>
      %24 = arith.mulf %18, %23 : vector<16x32xf32>
      %cst_18 = arith.constant dense<0.000000e+00> : vector<16xf32>
      %25 = vector.multi_reduction <add>, %24, %cst_18 [1] : vector<16x32xf32> to vector<16xf32>
      %26 = vector.shape_cast %25 : vector<16xf32> to vector<16x1xf32>
      %cst_19 = arith.constant 3.200000e+01 : f32
      %27 = vector.broadcast %cst_19 : f32 to vector<16x1xf32>
      %28 = arith.divf %26, %27 : vector<16x1xf32>
      %29 = vector.broadcast %28 : vector<16x1xf32> to vector<16x32xf32>
      %30 = arith.subf %24, %29 : vector<16x32xf32>
      %31 = vector.broadcast %28 : vector<16x1xf32> to vector<16x32xf32>
      %32 = arith.subf %24, %31 : vector<16x32xf32>
      %33 = arith.mulf %30, %32 : vector<16x32xf32>
      %cst_20 = arith.constant dense<0.000000e+00> : vector<16xf32>
      %34 = vector.multi_reduction <add>, %33, %cst_20 [1] : vector<16x32xf32> to vector<16xf32>
      %35 = vector.shape_cast %34 : vector<16xf32> to vector<16x1xf32>
      %cst_21 = arith.constant 3.200000e+01 : f32
      %36 = vector.broadcast %cst_21 : f32 to vector<16x1xf32>
      %37 = arith.divf %35, %36 : vector<16x1xf32>
      %38 = vector.broadcast %28 : vector<16x1xf32> to vector<16x32xf32>
      %39 = arith.subf %24, %38 : vector<16x32xf32>
      %cst_22 = arith.constant 9.99999996E-13 : f32
      %40 = vector.broadcast %cst_22 : f32 to vector<16x1xf32>
      %41 = arith.addf %37, %40 : vector<16x1xf32>
      %42 = math.rsqrt %41 : vector<16x1xf32>
      %43 = vector.broadcast %42 : vector<16x1xf32> to vector<16x32xf32>
      %44 = arith.mulf %39, %43 : vector<16x32xf32>
      %c0_23 = arith.constant 0 : index
      %c0_24 = arith.constant 0 : index
      %45 = vector.load %arg5[%c0_23, %c0_24] : memref<1x32xf32, #tpu.memory_space<vmem>>, vector<1x32xf32>
      %46 = vector.broadcast %45 : vector<1x32xf32> to vector<16x32xf32>
      %47 = arith.mulf %44, %46 : vector<16x32xf32>
      %c0_25 = arith.constant 0 : index
      %c0_26 = arith.constant 0 : index
      %48 = vector.load %arg6[%c0_25, %c0_26] : memref<1x32xf32, #tpu.memory_space<vmem>>, vector<1x32xf32>
      %49 = vector.broadcast %48 : vector<1x32xf32> to vector<16x32xf32>
      %50 = arith.addf %47, %49 : vector<16x32xf32>
      %51 = arith.truncf %50 : vector<16x32xf32> to vector<16x32xbf16>
      %c0_27 = arith.constant 0 : index
      %c0_28 = arith.constant 0 : index
      %52 = vector.load %arg10[%c0_27, %c0_28] : memref<16x32xbf16, #tpu.memory_space<vmem>>, vector<16x32xbf16>
      tpu.vector_store %arg10[%c0_27, %c0_28], %51 {strides = array<i32>} : memref<16x32xbf16, #tpu.memory_space<vmem>>, vector<16x32xbf16>,
    } else {
    }
    %c0 = arith.constant 0 : index
    %c0_1 = arith.constant 0 : index
    %3 = vector.load %arg10[%c0, %c0_1] : memref<16x32xbf16, #tpu.memory_space<vmem>>, vector<16x32xbf16>
    %c0_2 = arith.constant 0 : index
    %c0_3 = arith.constant 0 : index
    %4 = vector.load %arg7[%c0_2, %c0_3] : memref<32x256xbf16, #tpu.memory_space<vmem>>, vector<32x256xbf16>
    %cst = arith.constant dense<0.000000e+00> : vector<16x256xf32>
    %5 = tpu.matmul %3, %4, %cst {dimension_numbers = #tpu.dot_dimension_numbers<[1], [0], [0], [1], [0, 0, 1, 1], [], []>} : vector<16x32xbf16>, vector<32x256xbf16>, vector<16x256xf32> -> vector<16x256xf32>
    %c0_4 = arith.constant 0 : index
    %c0_5 = arith.constant 0 : index
    %6 = vector.load %arg8[%c0_4, %c0_5] : memref<1x256xf32, #tpu.memory_space<vmem>>, vector<1x256xf32>
    %7 = vector.broadcast %6 : vector<1x256xf32> to vector<16x256xf32>
    %8 = arith.addf %5, %7 : vector<16x256xf32>
    %9 = arith.truncf %8 : vector<16x256xf32> to vector<16x256xbf16>
    %c0_6 = arith.constant 0 : index
    %c0_7 = arith.constant 0 : index
    %10 = vector.load %arg9[%c0_6, %c0_7] : memref<16x256xbf16, #tpu.memory_space<vmem>>, vector<16x256xbf16>
    tpu.vector_store %arg9[%c0_6, %c0_7], %9 {strides = array<i32>} : memref<16x256xbf16, #tpu.memory_space<vmem>>, vector<16x256xbf16>,
    return
  }
  func.func @transform_0(%arg0: i32, %arg1: i32) -> (i32, i32) {
    %c0_i32 = arith.constant 0 : i32
    %c0_i32_0 = arith.constant 0 : i32
    return %arg0, %c0_i32 : i32, i32
  }
  func.func @transform_1(%arg0: i32, %arg1: i32) -> (i32, i32) {
    %c0_i32 = arith.constant 0 : i32
    %c0_i32_0 = arith.constant 0 : i32
    %c0_i32_1 = arith.constant 0 : i32
    return %c0_i32, %c0_i32_0 : i32, i32
  }
  func.func @transform_2(%arg0: i32, %arg1: i32) -> (i32, i32) {
    %c0_i32 = arith.constant 0 : i32
    %c0_i32_0 = arith.constant 0 : i32
    %c0_i32_1 = arith.constant 0 : i32
    return %c0_i32, %c0_i32_0 : i32, i32
  }
  func.func @transform_3(%arg0: i32, %arg1: i32) -> (i32, i32) {
    %c0_i32 = arith.constant 0 : i32
    %c0_i32_0 = arith.constant 0 : i32
    %c0_i32_1 = arith.constant 0 : i32
    return %c0_i32, %c0_i32_0 : i32, i32
  }
  func.func @transform_4(%arg0: i32, %arg1: i32) -> (i32, i32) {
    %c0_i32 = arith.constant 0 : i32
    %c0_i32_0 = arith.constant 0 : i32
    %c0_i32_1 = arith.constant 0 : i32
    return %c0_i32, %c0_i32_0 : i32, i32
  }
  func.func @transform_5(%arg0: i32, %arg1: i32) -> (i32, i32) {
    %c0_i32 = arith.constant 0 : i32
    %c0_i32_0 = arith.constant 0 : i32
    return %c0_i32, %arg1 : i32, i32
  }
  func.func @transform_6(%arg0: i32, %arg1: i32) -> (i32, i32) {
    %c0_i32 = arith.constant 0 : i32
    %c0_i32_0 = arith.constant 0 : i32
    return %c0_i32, %arg1 : i32, i32
  }
  func.func @transform_7(%arg0: i32, %arg1: i32) -> (i32, i32) {
    %c0_i32 = arith.constant 0 : i32
    return %arg0, %arg1 : i32, i32
  }
}

</mosaic_0001>

<bundles_post_ra>
// kernel: _run.1
= control target key start
LH: loop header
LB: loop body
LE: loop exit
PB: predicated region body
PF: predicated region fallthrough
CT: control target
= control target key end

     0   :  { %12 = vsyncpa [#allocation4], 0  ;;  %s723_s0 = inlined_call_operand.hbm [shape: bf16[16,32], index: 0, kind: input, shape index: {}]   ;;  %s724_s1 = inlined_call_operand.hbm [shape: bf16[32,32], index: 1, kind: input, shape index: {}]   ;;  %s725_s2 = inlined_call_operand.vmem [shape: f32[1,32], index: 2, kind: input, shape index: {}]   ;;  %s726_s3 = inlined_call_operand.hbm [shape: f32[1,32], index: 3, kind: input, shape index: {}]   ;;  %s727_s4 = inlined_call_operand.hbm [shape: f32[1,32], index: 4, kind: input, shape index: {}]   ;;  %s728_s5 = inlined_call_operand.hbm [shape: bf16[32,256], index: 5, kind: input, shape index: {}]   ;;  %s729_s6 = inlined_call_operand.vmem [shape: f32[1,256], index: 6, kind: input, shape index: {}]   ;;  %s730_s7 = inlined_call_operand.hbm [shape: bf16[16,256], index: 7, kind: output, shape index: {}]  }
   0x1   :  { %13 = vsyncpa [#allocation7], 0 }
   0x2   :  { %14 = vsyncpa [#allocation10], 0 }
   0x3   :  { %15 = vsyncpa [#allocation5], 0  ;;  %s33_s26 = sshll.u32 %s724_s1, 4  ;;  %s622_s27 = smov [#allocation6]   ;;  %s34_s26 = int_to_ptr.hbm [resolvable:$true] %s33_s26 }
   0x4   :  { %s35_s28 = sshll.u32 %s622_s27, 4  ;;  %s60_s8 = sshll.u32 %s727_s4, 4  ;;  %s36_s28 = int_to_ptr.vmem [resolvable:$true] %s35_s28  ;;  %s61_s8 = int_to_ptr.hbm [resolvable:$true] %s60_s8 }
   0x5   :  { %s623_s9 = smov 64   ;;  %s624_s10 = smov 4  }
   0x6   :  { %41 = dma.hbm_to_vmem [thread:$0]  %s34_s26, 256, %s36_s28, [#allocation7], %s623_s9, %s623_s9, %s624_s10  }
   0x7   :  { %s625_s11 = smov [#allocation9]   ;;  %s20_s15 = sshll.u32 %s723_s0, 4  ;;  %s21_s15 = int_to_ptr.hbm [resolvable:$true] %s20_s15 }
   0x8   :  { %s62_s12 = sshll.u32 %s625_s11, 4  ;;  %s49_s17 = sshll.u32 %s726_s3, 4  ;;  %s63_s12 = int_to_ptr.vmem [resolvable:$true] %s62_s12  ;;  %s50_s17 = int_to_ptr.hbm [resolvable:$true] %s49_s17 }
   0x9   :  { %65 = dma.hbm_to_vmem [thread:$0]  %s61_s8, 16, %s63_s12, [#allocation10]  }
   0xa   :  { %s626_s18 = smov [#allocation3]   ;;  %s627_s4 = smov [#allocation8]  }
   0xb   :  { %s22_s19 = sshll.u32 %s626_s18, 4  ;;  %s51_s20 = sshll.u32 %s627_s4, 4  ;;  %s23_s19 = int_to_ptr.vmem [resolvable:$true] %s22_s19  ;;  %s52_s20 = int_to_ptr.vmem [resolvable:$true] %s51_s20 }
   0xc   :  { %28 = dma.hbm_to_vmem [thread:$0]  %s21_s15, 128, %s23_s19, [#allocation4], %s623_s9, %s623_s9, %s624_s10  }
   0xd   :  { %s70_s23 = sshll.u32 %s728_s5, 4  ;;  %s628_s0 = smov [#allocation11]   ;;  %s71_s23 = int_to_ptr.hbm [resolvable:$true] %s70_s23 }
   0xe   :  { %54 = dma.hbm_to_vmem [thread:$0]  %s50_s17, 16, %s52_s20, [#allocation7]  }
   0xf   :  { %s72_s24 = sshll.u32 %s628_s0, 4  ;;  %s629_s25 = smov 128   ;;  %s73_s24 = int_to_ptr.vmem [resolvable:$true] %s72_s24 }
  0x10   :  { %s630_s26 = smov 8  }
  0x11   :  { %78 = dma.hbm_to_vmem [thread:$0]  %s71_s23, 512, %s73_s24, [#allocation10], %s629_s25, %s629_s25, %s630_s26  }
  0x12   :  { %614 = dma.done.wait [#allocation4], 128  }
  0x13   :  { %615 = vsyncadd [#allocation4], 4294967168 }
  0x14   :  { %616 = dma.done.wait [#allocation7], 272  }
  0x15   :  { %617 = vsyncadd [#allocation7], 4294967024 }
  0x16   :  { %618 = dma.done.wait [#allocation10], 528  }
  0x17   :  { %619 = vsyncadd [#allocation10], 4294966768  ;;  %v440_v0 = vld [vmem:[#allocation6 + $0x8] sm:$0xff]  ;;  %v439_v1 = vld [vmem:[#allocation6] sm:$0xff]  ;;  %vm133_vm0 = vcmask 261120   ;;  %vm304_vm14 = vcmask 257024  }
  0x18   :  { %143 = vmatpush.bf16.msra.mxu0 %v440_v0  ;;  %v438_v2 = vld [vmem:[#allocation3] sm:$0xff]  ;;  %v457_v3 = vld [vmem:[%s725_s2] ss:$0 sm:$0xff]  ;;  %s632_s28 = smov [#allocation12]   ;;  %s386_s9 = sshll.u32 %s730_s7, 4  ;;  %s387_s9 = int_to_ptr.hbm [resolvable:$true] %s386_s9 }
  0x19   :  { %s384_s29 = sshll.u32 %s632_s28, 4  ;;  %s385_s29 = int_to_ptr.vmem [resolvable:$true] %s384_s29 }
  0x1c   :  { %144 = vmatpush.bf16.msra.mxu0 %v439_v1 }
  0x1f   :  { %413 = vmatmul.msk.bf16.vlgmr.msra.gmra.mxu0 %vm133_vm0, %v438_v2 }
  0x9c   :  { %v146_v4 = vpop.f32.mrf.mxu0 }
  0x9d   :  { %v695_v5 = vadd.f32 %v457_v3, %v146_v4 }
  0x9f   :  { %v153_v6 = vmul.f32 0.70710677, %v695_v5 }
  0xa1   :  { %v155_v7 = vmul.f32 %v153_v6, %v153_v6 }
  0xa3   :  { %v156_v8 = vmin.f32 %v155_v7, 16.0 }
  0xa4   :  { %v148_v9 = vpop.f32.mrf.mxu0 }
  0xa5   :  { %v157_v10 = vmul.f32 2.1237322e-06, %v156_v8  ;;  %v698_v11 = vadd.f32 %v457_v3, %v148_v9  ;;  %v168_v12 = vmul.f32 3.8918573e-05, %v156_v8 }
  0xa7   :  { %v158_v13 = vadd.f32 0.00028619796, %v157_v10  ;;  %v701_v14 = vmul.f32 0.70710677, %v698_v11  ;;  %v169_v15 = vadd.f32 0.001143296, %v168_v12 }
  0xa9   :  { %v159_v16 = vmul.f32 %v158_v13, %v156_v8  ;;  %v195_v17 = vmul.f32 %v701_v14, %v701_v14  ;;  %v170_v18 = vmul.f32 %v169_v15, %v156_v8  ;;  %v151_v13 = vmul.f32 0.5, %v695_v5 }
  0xab   :  { %v196_v19 = vmin.f32 %v195_v17, 16.0  ;;  %v171_v20 = vadd.f32 0.014752088, %v170_v18  ;;  %v160_v21 = vadd.f32 0.0036580483, %v159_v16 }
  0xad   :  { %v197_v22 = vmul.f32 2.1237322e-06, %v196_v19  ;;  %v208_v23 = vmul.f32 3.8918573e-05, %v196_v19  ;;  %v172_v24 = vmul.f32 %v171_v20, %v156_v8  ;;  %v161_v28 = vmul.f32 %v160_v21, %v156_v8 }
  0xaf   :  { %v198_v25 = vadd.f32 0.00028619796, %v197_v22  ;;  %v209_v26 = vadd.f32 0.001143296, %v208_v23  ;;  %v173_v27 = vadd.f32 0.112945676, %v172_v24 }
  0xb0   :  { %v162_v35 = vadd.f32 0.05243302, %v161_v28  ;;  %v152_v23 = vmul.f32 0.5, %v698_v11 }
  0xb1   :  { %v199_v29 = vmul.f32 %v198_v25, %v196_v19  ;;  %v210_v30 = vmul.f32 %v209_v26, %v196_v19  ;;  %v174_v31 = vmul.f32 %v173_v27, %v156_v8  ;;  %v631_v26 = vmov 32.0  }
  0xb2   :  { %v163_v41 = vmul.f32 %v162_v35, %v156_v8 }
  0xb3   :  { %v211_v32 = vadd.f32 0.014752088, %v210_v30  ;;  %v200_v33 = vadd.f32 0.0036580483, %v199_v29  ;;  %v175_v34 = vadd.f32 0.4994258, %v174_v31 }
  0xb4   :  { %v164_v45 = vadd.f32 0.18741608, %v163_v41 }
  0xb5   :  { %v212_v36 = vmul.f32 %v211_v32, %v196_v19  ;;  %v176_v37 = vmul.f32 %v175_v34, %v156_v8  ;;  %v201_v39 = vmul.f32 %v200_v33, %v196_v19 }
  0xb6   :  { %v165_v50 = vmul.f32 %v164_v45, %v156_v8  ;;  %v445_v45 = vld [vmem:[#allocation11 + $0x14] sm:$0xf0] }
  0xb7   :  { %v213_v38 = vadd.f32 0.112945676, %v212_v36  ;;  %v177_v40 = vadd.f32 1.0, %v176_v37  ;;  %v202_v44 = vadd.f32 0.05243302, %v201_v39 }
  0xb8   :  { %v166_v55 = vadd.f32 1.1283791, %v165_v50  ;;  %v443_v50 = vld [vmem:[#allocation11 + $0x4] sm:$0xf0] }
  0xb9   :  { %v214_v42 = vmul.f32 %v213_v38, %v196_v19  ;;  %460 = vrcp.f32 %v177_v40  ;;  %v203_v49 = vmul.f32 %v202_v44, %v196_v19  ;;  %v189_v54 = vand.u32 2147483648, %v177_v40  ;;  %v430_v44 = vld [vmem:[#allocation11 + $0x10] sm:$0xf] }
  0xba   :  { %v187_v57 = vand.u32 2147483647, %v177_v40  ;;  %vm183_vm2 = vweird.f32 %v177_v40  ;;  %v167_v63 = vmul.f32 %v166_v55, %v153_v6 }
  0xbb   :  { %v215_v43 = vadd.f32 0.4994258, %v214_v42  ;;  %v204_v53 = vadd.f32 0.18741608, %v203_v49  ;;  %v190_v61 = vor.u32 1.1754944e-38, %v189_v54 }
  0xbc   :  { %vm188_vm4 = vcmp.eq.f32.partialorder %v187_v57, 8.507059e+37  ;;  %v422_v49 = vld [vmem:[#allocation11] sm:$0xf]  ;;  %v424_v54 = vld [vmem:[#allocation11 + $0x8] sm:$0xf0] }
  0xbd   :  { %v216_v46 = vmul.f32 %v215_v43, %v196_v19  ;;  %v205_v60 = vmul.f32 %v204_v53, %v196_v19  ;;  %v442_v53 = vld [vmem:[#allocation11 + $0x4] sm:$0xf] }
  0xbe   :  { %v427_v57 = vor.u32 %v442_v53, %v424_v54 }
  0xbf   :  { %v217_v47 = vadd.f32 1.0, %v216_v46  ;;  %v461_v48 = vpop.eup %460  ;;  %v206_v7 = vadd.f32 1.1283791, %v205_v60  ;;  %v444_v46 = vld [vmem:[#allocation11 + $0x14] sm:$0xf] }
  0xc0   :  { %v179_v51 = vmul.f32 %v461_v48, %v177_v40  ;;  %vm184_vm1 = vweird.f32 %v461_v48 }
  0xc1   :  { %462 = vrcp.f32 %v217_v47  ;;  %vm185_vm3 = vmor %vm183_vm2, %vm184_vm1  ;;  %v229_v4 = vand.u32 2147483648, %v217_v47  ;;  %v227_v9 = vand.u32 2147483647, %v217_v47  ;;  %vm223_vm6 = vweird.f32 %v217_v47 }
  0xc2   :  { %v180_v52 = vsub.f32 1.0, %v179_v51  ;;  %v207_v6 = vmul.f32 %v206_v7, %v701_v14  ;;  %464 = vrcp.f32 %v631_v26 }
  0xc3   :  { %v230_v16 = vor.u32 1.1754944e-38, %v229_v4  ;;  %vm228_vm8 = vcmp.eq.f32.partialorder %v227_v9, 8.507059e+37 }
  0xc4   :  { %v181_v56 = vmul.f32 %v461_v48, %v180_v52 }
  0xc6   :  { %v182_v59 = vadd.f32 %v461_v48, %v181_v56  ;;  %v423_v56 = vor.u32 %v443_v50, %v422_v49 }
  0xc7   :  { %v463_v58 = vpop.eup %462 }
  0xc8   :  { %v219_v62 = vmul.f32 %v463_v58, %v217_v47  ;;  %v186_v0 = vsel %vm185_vm3, %v461_v48, %v182_v59  ;;  %vm224_vm5 = vweird.f32 %v463_v58  ;;  %v465_v27 = vpop.eup %464  ;;  %v431_v47 = vor.u32 %v445_v45, %v430_v44  ;;  %v432_v48 = vld [vmem:[#allocation11 + $0x18] sm:$0xf0] }
  0xc9   :  { %v191_v1 = vsel %vm188_vm4, %v190_v61, %v186_v0  ;;  %vm225_vm7 = vmor %vm223_vm6, %vm224_vm5  ;;  %v246_v14 = vmul.f32 32.0, %v465_v27  ;;  %vm250_vm9 = vweird.f32 %v465_v27  ;;  %v435_v52 = vor.u32 %v444_v46, %v432_v48 }
  0xca   :  { %v220_v2 = vsub.f32 1.0, %v219_v62  ;;  %v192_v3 = vmul.f32 %v191_v1, %v167_v63  ;;  %354 = vmatpush.bf16.msra.mxu1 %v431_v47 }
  0xcb   :  { %v247_v28 = vsub.f32 1.0, %v246_v14  ;;  %368 = vmatpush.bf16.msra.mxu2 %v435_v52 }
  0xcc   :  { %v221_v8 = vmul.f32 %v463_v58, %v220_v2  ;;  %v414_v10 = vclamps-f32 %v192_v3, 1.0  ;;  %v458_v3 = vld [vmem:[#allocation8] ss:$0 sm:$0xff] }
  0xcd   :  { %v248_v29 = vmul.f32 %v465_v27, %v247_v28 }
  0xce   :  { %v222_v12 = vadd.f32 %v463_v58, %v221_v8  ;;  %v235_v15 = vadd.f32 1.0, %v414_v10  ;;  %355 = vmatpush.bf16.msra.mxu1 %v423_v56  ;;  %v459_v8 = vld [vmem:[#allocation9] ss:$0 sm:$0xff] }
  0xcf   :  { %v249_v30 = vadd.f32 %v465_v27, %v248_v29  ;;  %369 = vmatpush.bf16.msra.mxu2 %v427_v57 }
  0xd0   :  { %v226_v17 = vsel %vm225_vm7, %v463_v58, %v222_v12  ;;  %v237_v18 = vmul.f32 %v235_v15, %v151_v13 }
  0xd1   :  { %v231_v19 = vsel %vm228_vm8, %v230_v16, %v226_v17  ;;  %v251_v31 = vsel %vm250_vm9, %v465_v27, %v249_v30 }
  0xd2   :  { %v232_v20 = vmul.f32 %v231_v19, %v207_v6  ;;  %v239_v21 = vsel %vm133_vm0, %v237_v18, 0.0 }
  0xd3   :  { %240 = vadd.xlane.f32.xlu0 %v239_v21 }
  0xd4   :  { %v415_v22 = vclamps-f32 %v232_v20, 1.0 }
  0xd6   :  { %v236_v24 = vadd.f32 1.0, %v415_v22 }
  0xd8   :  { %v238_v25 = vmul.f32 %v236_v24, %v152_v23  ;;  %v313_v23 = vld [vmem:[%s729_s6] sm:$0x3] }
  0xda   :  { %v242_v5 = vsel %vm133_vm0, %v238_v25, 0.0 }
  0xdb   :  { %243 = vadd.xlane.f32.xlu0 %v242_v5  ;;  %v316_v5 = vperm.slane %v313_v23, 1 }
 0x146   :  { %v241_v32 = vpop.xlane.xlu0 %240 }
 0x147   :  { %v252_v33 = vmul.f32 %v251_v31, %v241_v32 }
 0x149   :  { %v254_v34 = vsub.f32 %v237_v18, %v252_v33 }
 0x14b   :  { %v256_v35 = vmul.f32 %v254_v34, %v254_v34 }
 0x14d   :  { %v258_v11 = vsel %vm133_vm0, %v256_v35, 0.0 }
 0x14e   :  { %259 = vadd.xlane.f32.xlu1 %v258_v11  ;;  %v244_v36 = vpop.xlane.xlu0 %243 }
 0x14f   :  { %v253_v37 = vmul.f32 %v251_v31, %v244_v36 }
 0x151   :  { %v255_v38 = vsub.f32 %v238_v25, %v253_v37  ;;  %v315_v25 = vperm.slane %v313_v23, 0 }
 0x153   :  { %v257_v39 = vmul.f32 %v255_v38, %v255_v38 }
 0x155   :  { %v261_v40 = vsel %vm133_vm0, %v257_v39, 0.0 }
 0x156   :  { %262 = vadd.xlane.f32.xlu1 %v261_v40 }
 0x1c1   :  { %v260_v41 = vpop.xlane.xlu1 %259 }
 0x1c2   :  { %v264_v42 = vmul.f32 %v260_v41, %v251_v31 }
 0x1c4   :  { %v266_v43 = vadd.f32 1e-12, %v264_v42 }
 0x1c6   :  { %466 = vrsqrt.f32 %v266_v43  ;;  %vm274_vm11 = vweird.f32 %v266_v43 }
 0x1c9   :  { %v263_v51 = vpop.xlane.xlu1 %262 }
 0x1ca   :  { %v265_v55 = vmul.f32 %v263_v51, %v251_v31 }
 0x1cc   :  { %v467_v58 = vpop.eup %466  ;;  %v267_v59 = vadd.f32 1e-12, %v265_v55 }
 0x1cd   :  { %v269_v60 = vmul.f32 %v467_v58, %v266_v43  ;;  %vm275_vm10 = vweird.f32 %v467_v58 }
 0x1ce   :  { %468 = vrsqrt.f32 %v267_v59  ;;  %vm276_vm12 = vmor %vm274_vm11, %vm275_vm10  ;;  %vm284_vm15 = vweird.f32 %v267_v59 }
 0x1cf   :  { %v270_v61 = vmul.f32 %v467_v58, %v269_v60 }
 0x1d1   :  { %v271_v62 = vmul.f32 0.5, %v270_v61 }
 0x1d3   :  { %v272_v63 = vsub.f32 1.5, %v271_v62 }
 0x1d4   :  { %v469_v0 = vpop.eup %468 }
 0x1d5   :  { %v273_v1 = vmul.f32 %v467_v58, %v272_v63  ;;  %v279_v2 = vmul.f32 %v469_v0, %v267_v59  ;;  %vm285_vm13 = vweird.f32 %v469_v0 }
 0x1d6   :  { %vm286_vm1 = vmor %vm284_vm15, %vm285_vm13 }
 0x1d7   :  { %v277_v4 = vsel %vm276_vm12, %v467_v58, %v273_v1  ;;  %v280_v7 = vmul.f32 %v469_v0, %v279_v2 }
 0x1d8   :  { %v288_v9 = vmul.f32 %v277_v4, %v254_v34 }
 0x1d9   :  { %v281_v10 = vmul.f32 0.5, %v280_v7 }
 0x1da   :  { %v294_v12 = vmul.f32 %v458_v3, %v288_v9 }
 0x1db   :  { %v282_v13 = vsub.f32 1.5, %v281_v10 }
 0x1dc   :  { %v300_v15 = vadd.f32 %v459_v8, %v294_v12 }
 0x1dd   :  { %v283_v16 = vmul.f32 %v469_v0, %v282_v13 }
 0x1de   :  { %v302_v6 = vpack.c.bf16 %v300_v15, %v300_v15 }
 0x1df   :  { %v287_v17 = vsel %vm286_vm1, %v469_v0, %v283_v16 }
 0x1e0   :  { %305 = vst.msk [vmem:[#allocation2] sm:$0xf] %vm304_vm14, %v302_v6  ;;  %v289_v18 = vmul.f32 %v287_v17, %v255_v38 }
 0x1e2   :  { %v295_v19 = vmul.f32 %v458_v3, %v289_v18 }
 0x1e4   :  { %v301_v20 = vadd.f32 %v459_v8, %v295_v19 }
 0x1e6   :  { %v303_v21 = vpack.c.bf16 %v301_v20, %v301_v20 }
 0x1e8   :  { %306 = vst.msk [vmem:[#allocation2 + $0x4] sm:$0xf] %vm304_vm14, %v303_v21 }
 0x1ef   :  { %v441_v22 = vld [vmem:[#allocation2] sm:$0xff] }
 0x1f0   :  { %436 = vmatmul.msk.bf16.vlgmr.msra.gmra.mxu1 %vm133_vm0, %v441_v22  ;;  %437 = vmatmul.msk.bf16.vlgmr.msra.gmra.mxu2 %vm133_vm0, %v441_v22 }
 0x26d   :  { %v357_v24 = vpop.f32.mrf.mxu1 }
 0x26e   :  { %v358_v27 = vadd.f32 %v357_v24, %v315_v25 }
 0x273   :  { %v371_v26 = vpop.f32.mrf.mxu2 }
 0x274   :  { %v372_v14 = vadd.f32 %v371_v26, %v316_v5 }
 0x275   :  { %v359_v29 = vpop.f32.mrf.mxu1 }
 0x276   :  { %v376_v28 = vpack.c.bf16 %v372_v14, %v358_v27  ;;  %v360_v31 = vadd.f32 %v359_v29, %v315_v25 }
 0x278   :  { %378 = vst [vmem:[#allocation12] sm:$0xff] %v376_v28 }
 0x27b   :  { %v373_v30 = vpop.f32.mrf.mxu2 }
 0x27c   :  { %v374_v32 = vadd.f32 %v373_v30, %v316_v5 }
 0x27e   :  { %v377_v33 = vpack.c.bf16 %v374_v32, %v360_v31 }
 0x280   :  { %379 = vst [vmem:[#allocation12 + $0x8] sm:$0xff] %v377_v33 }
 0x281   :  { %392 = dma.vmem_to_hbm [thread:$0]  %s385_s29, 256, %s387_s9, [#allocation5], %s629_s25, %s629_s25, %s630_s26  }
 0x282   :  { %620 = dma.done.wait [#allocation5], 256  }
 0x283   :  { %621 = vsyncadd [#allocation5], 4294967040 }
 0x284   :  { %397 = vsyncpa [#allocation4], 1 }
 0x285   :  { %398 = vsyncpa [#allocation7], 1 }
 0x286   :  { %399 = vsyncpa [#allocation10], 1 }
 0x287   :  { %400 = vsyncpa [#allocation5], 1 }

</bundles_post_ra>
